<compile_context>
chip_gen: v6e
topology: v6e:2x2x1
jax: 0.10.0
libtpu: 0.0.40
codegen_flags: <defaults>
</compile_context>

<pallas_src>
import jax
import jax.numpy as jnp
from jax.experimental import pallas as pl
from jax.experimental.pallas import tpu as pltpu

MAX_TILE_B = 2048   # batch-tile cap (multiple of 8); fits easily in VMEM on v5e/v6e/v7x
SPLIT_ROWS = 256    # batches >= this always get >= 2 tiles (keeps v7x's 2 TCs busy)


def _round_up(n, m):
    return ((n + m - 1) // m) * m


def _cdiv(a, b):
    return (a + b - 1) // b


def _batch_tiling(batch):
    """Pick (tile_b, padded_batch, n_tiles) with <= 8 rows of padding per tile."""
    b8 = _round_up(batch, 8)
    n_tiles = max(1, _cdiv(b8, MAX_TILE_B))
    if n_tiles == 1 and b8 >= SPLIT_ROWS:
        n_tiles = 2
    tile_b = _round_up(_cdiv(b8, n_tiles), 8)
    return tile_b, n_tiles * tile_b, n_tiles


def vanetwork_kernel(x_ref, w1_ref, b1_ref, wq_ref, bq_ref, q_ref):
    # fc1: (TB, in) @ (in, hid) -> f32 MXU accumulate, bias, ReLU.
    h = jnp.dot(x_ref[...], w1_ref[...],
                preferred_element_type=jnp.float32) + b1_ref[...]
    h = jnp.maximum(h, 0.0).astype(jnp.bfloat16)
    # Fused dueling head (advantage pre-centered, value head folded in):
    # (TB, hid) @ (hid, out) + b -> Q directly, stored un-padded.
    q_ref[...] = jnp.dot(h, wq_ref[...],
                         preferred_element_type=jnp.float32) + bq_ref[...]


def prepare_params(w1, b1, wa, ba, wv, bv):
    """One-time weight prep (hoisted out of the per-call forward).

    Weights are stored transposed, (in, out) layout.  Centering and the V-fold
    happen in f32 *before* the bf16 cast so the mean identity is exact.
    """
    wa_c = wa - wa.mean(axis=1, keepdims=True)   # center advantage weights
    ba_c = ba - ba.mean(axis=1, keepdims=True)
    wq = wa_c + wv                               # (hidden, out): value head folded in
    bq = ba_c + bv                               # (1, out)
    return (w1.astype(jnp.bfloat16), b1.astype(jnp.float32),
            wq.astype(jnp.bfloat16), bq.astype(jnp.float32))


def vanetwork_forward(x, prepared):
    """x: (B, input_size) f32.  prepared: output of prepare_params().  Returns (B, out) f32."""
    w1_b, b1_f, wq_b, bq_f = prepared
    batch, in_size = x.shape
    hidden = w1_b.shape[1]
    out_size = wq_b.shape[1]

    tile_b, b_p, n_tiles = _batch_tiling(batch)

    # Per-call input handling only: bf16 cast (+ batch pad if needed).
    x_b = x.astype(jnp.bfloat16)
    if b_p != batch:
        x_b = jnp.zeros((b_p, in_size), jnp.bfloat16).at[:batch].set(x_b)

    flops = 2 * b_p * in_size * hidden + 2 * b_p * hidden * out_size
    bytes_accessed = (x_b.size * 2 + w1_b.size * 2 + wq_b.size * 2
                      + b1_f.size * 4 + bq_f.size * 4 + b_p * out_size * 4)

    q_p = pl.pallas_call(
        vanetwork_kernel,
        out_shape=jax.ShapeDtypeStruct((b_p, out_size), jnp.float32),
        grid_spec=pltpu.PrefetchScalarGridSpec(
            num_scalar_prefetch=0,
            grid=(n_tiles,),
            in_specs=[
                pl.BlockSpec((tile_b, in_size), lambda i: (i, 0)),    # x tile
                pl.BlockSpec((in_size, hidden), lambda i: (0, 0)),    # W1 (resident)
                pl.BlockSpec((1, hidden), lambda i: (0, 0)),          # b1 (resident)
                pl.BlockSpec((hidden, out_size), lambda i: (0, 0)),   # fused head W
                pl.BlockSpec((1, out_size), lambda i: (0, 0)),        # fused head b
            ],
            out_specs=pl.BlockSpec((tile_b, out_size), lambda i: (i, 0)),
        ),
        compiler_params=pltpu.CompilerParams(
            dimension_semantics=("parallel",)),   # batch tiles over both TCs on v7x
        cost_estimate=pl.CostEstimate(flops=flops, transcendentals=0,
                                      bytes_accessed=bytes_accessed),
    )(x_b, w1_b, b1_f, wq_b, bq_f)

    return q_p[:batch] if b_p != batch else q_p


def init_params(key, input_size, hidden_size, output_size):
    """Deterministic synthetic params (PyTorch Linear shapes, stored transposed)."""
    k1, k2, k3, k4, k5, k6 = jax.random.split(key, 6)
    w1 = jax.random.normal(k1, (input_size, hidden_size), jnp.float32) * 0.1
    b1 = jax.random.normal(k2, (1, hidden_size), jnp.float32) * 0.1
    wa = jax.random.normal(k3, (hidden_size, output_size), jnp.float32) * 0.1
    ba = jax.random.normal(k4, (1, output_size), jnp.float32) * 0.1
    wv = jax.random.normal(k5, (hidden_size, 1), jnp.float32) * 0.1
    bv = jax.random.normal(k6, (1, 1), jnp.float32) * 0.1
    return w1, b1, wa, ba, wv, bv


def reference_forward(x, w1, b1, wa, ba, wv, bv):
    """Plain-JAX f32 reference mirroring the PyTorch forward exactly."""
    h = jnp.maximum(x @ w1 + b1, 0.0)
    a = h @ wa + ba
    v = h @ wv + bv
    return v + a - a.mean(axis=1).reshape(-1, 1)


if __name__ == "__main__":
    # Small shapes consistent with the module: a dueling DQN head.
    batch = 8
    input_size = 16     # state dim
    hidden_size = 32
    output_size = 4     # number of actions

    key = jax.random.PRNGKey(0)
    kx, kp = jax.random.split(key)
    x = jax.random.normal(kx, (batch, input_size), jnp.float32)
    params = init_params(kp, input_size, hidden_size, output_size)

    prepared = prepare_params(*params)          # one-time weight prep
    q = vanetwork_forward(x, prepared)
    q = jax.block_until_ready(q)

    q_ref = reference_forward(x, *params)
    assert q.shape == (batch, output_size)
    # bf16 matmul operands -> relaxed tolerance vs the f32 reference.
    assert jnp.allclose(q, q_ref, atol=2e-2, rtol=2e-2), "Pallas kernel mismatch"

    print("KERNEL_OK")
</pallas_src>

<mosaic_0001>
module attributes {stable_mosaic.version = 11 : i64} {
  func.func @vanetwork_kernel(%arg0: i32, %arg1: memref<8x16xbf16, #tpu.memory_space<vmem>>, %arg2: memref<16x32xbf16, #tpu.memory_space<vmem>>, %arg3: memref<1x32xf32, #tpu.memory_space<vmem>>, %arg4: memref<32x4xbf16, #tpu.memory_space<vmem>>, %arg5: memref<1x4xf32, #tpu.memory_space<vmem>>, %arg6: memref<8x4xf32, #tpu.memory_space<vmem>>) attributes {dimension_semantics = [#tpu.dimension_semantics<parallel>], iteration_bounds = array<i64: 1>, scalar_prefetch = 0 : i64, scratch_operands = 0 : i64, tpu.core_type = #tpu.core_type<tc>, window_params = [{transform_indices = @transform_0, window_bounds = array<i64: 8, 16>}, {pipeline_mode = #tpu.pipeline_mode<synchronous>, transform_indices = @transform_1, window_bounds = array<i64: 16, 32>}, {pipeline_mode = #tpu.pipeline_mode<synchronous>, transform_indices = @transform_2, window_bounds = array<i64: 1, 32>}, {pipeline_mode = #tpu.pipeline_mode<synchronous>, transform_indices = @transform_3, window_bounds = array<i64: 32, 4>}, {pipeline_mode = #tpu.pipeline_mode<synchronous>, transform_indices = @transform_4, window_bounds = array<i64: 1, 4>}, {transform_indices = @transform_5, window_bounds = array<i64: 8, 4>}]} {
    %c0 = arith.constant 0 : index
    %c0_0 = arith.constant 0 : index
    %0 = vector.load %arg1[%c0, %c0_0] : memref<8x16xbf16, #tpu.memory_space<vmem>>, vector<8x16xbf16>
    %c0_1 = arith.constant 0 : index
    %c0_2 = arith.constant 0 : index
    %1 = vector.load %arg2[%c0_1, %c0_2] : memref<16x32xbf16, #tpu.memory_space<vmem>>, vector<16x32xbf16>
    %cst = arith.constant dense<0.000000e+00> : vector<8x32xf32>
    %2 = tpu.matmul %0, %1, %cst {dimension_numbers = #tpu.dot_dimension_numbers<[1], [0], [0], [1], [0, 0, 1, 1], [], []>} : vector<8x16xbf16>, vector<16x32xbf16>, vector<8x32xf32> -> vector<8x32xf32>
    %c0_3 = arith.constant 0 : index
    %c0_4 = arith.constant 0 : index
    %3 = vector.load %arg3[%c0_3, %c0_4] : memref<1x32xf32, #tpu.memory_space<vmem>>, vector<1x32xf32>
    %4 = vector.broadcast %3 : vector<1x32xf32> to vector<8x32xf32>
    %5 = arith.addf %2, %4 : vector<8x32xf32>
    %cst_5 = arith.constant 0.000000e+00 : f32
    %6 = vector.broadcast %cst_5 : f32 to vector<8x32xf32>
    %7 = arith.maximumf %5, %6 : vector<8x32xf32>
    %8 = arith.truncf %7 : vector<8x32xf32> to vector<8x32xbf16>
    %c0_6 = arith.constant 0 : index
    %c0_7 = arith.constant 0 : index
    %9 = vector.load %arg4[%c0_6, %c0_7] : memref<32x4xbf16, #tpu.memory_space<vmem>>, vector<32x4xbf16>
    %cst_8 = arith.constant dense<0.000000e+00> : vector<8x4xf32>
    %10 = tpu.matmul %8, %9, %cst_8 {dimension_numbers = #tpu.dot_dimension_numbers<[1], [0], [0], [1], [0, 0, 1, 1], [], []>} : vector<8x32xbf16>, vector<32x4xbf16>, vector<8x4xf32> -> vector<8x4xf32>
    %c0_9 = arith.constant 0 : index
    %c0_10 = arith.constant 0 : index
    %11 = vector.load %arg5[%c0_9, %c0_10] : memref<1x4xf32, #tpu.memory_space<vmem>>, vector<1x4xf32>
    %12 = vector.broadcast %11 : vector<1x4xf32> to vector<8x4xf32>
    %13 = arith.addf %10, %12 : vector<8x4xf32>
    %c0_11 = arith.constant 0 : index
    %c0_12 = arith.constant 0 : index
    %14 = vector.load %arg6[%c0_11, %c0_12] : memref<8x4xf32, #tpu.memory_space<vmem>>, vector<8x4xf32>
    tpu.vector_store %arg6[%c0_11, %c0_12], %13 {strides = array<i32>} : memref<8x4xf32, #tpu.memory_space<vmem>>, vector<8x4xf32>,
    return
  }
  func.func @transform_0(%arg0: i32) -> (i32, i32) {
    %c0_i32 = arith.constant 0 : i32
    %c0_i32_0 = arith.constant 0 : i32
    return %arg0, %c0_i32 : i32, i32
  }
  func.func @transform_1(%arg0: i32) -> (i32, i32) {
    %c0_i32 = arith.constant 0 : i32
    %c0_i32_0 = arith.constant 0 : i32
    %c0_i32_1 = arith.constant 0 : i32
    return %c0_i32, %c0_i32_0 : i32, i32
  }
  func.func @transform_2(%arg0: i32) -> (i32, i32) {
    %c0_i32 = arith.constant 0 : i32
    %c0_i32_0 = arith.constant 0 : i32
    %c0_i32_1 = arith.constant 0 : i32
    return %c0_i32, %c0_i32_0 : i32, i32
  }
  func.func @transform_3(%arg0: i32) -> (i32, i32) {
    %c0_i32 = arith.constant 0 : i32
    %c0_i32_0 = arith.constant 0 : i32
    %c0_i32_1 = arith.constant 0 : i32
    return %c0_i32, %c0_i32_0 : i32, i32
  }
  func.func @transform_4(%arg0: i32) -> (i32, i32) {
    %c0_i32 = arith.constant 0 : i32
    %c0_i32_0 = arith.constant 0 : i32
    %c0_i32_1 = arith.constant 0 : i32
    return %c0_i32, %c0_i32_0 : i32, i32
  }
  func.func @transform_5(%arg0: i32) -> (i32, i32) {
    %c0_i32 = arith.constant 0 : i32
    %c0_i32_0 = arith.constant 0 : i32
    return %arg0, %c0_i32 : i32, i32
  }
}

</mosaic_0001>

<bundles_post_ra>
// kernel: tpu_custom_call.1
= control target key start
LH: loop header
LB: loop body
LE: loop exit
PB: predicated region body
PF: predicated region fallthrough
CT: control target
= control target key end

     0   :  { %v187_v0 = vmov 0.0   ;;  %vm188_vm0 = vmmov 0   ;;  %vm37_vm1 = vcmask 130048   ;;  %vm106_vm2 = vcmask 261120   ;;  %s240_s1 = inlined_call_operand.vmem [shape: bf16[16,32], index: 1, kind: input, shape index: {}]   ;;  %s241_s0 = inlined_call_operand.vmem [shape: bf16[8,16], index: 0, kind: input, shape index: {}]   ;;  %s242_s3 = inlined_call_operand.vmem [shape: bf16[32,4], index: 3, kind: input, shape index: {}]   ;;  %s243_s2 = inlined_call_operand.vmem [shape: f32[1,32], index: 2, kind: input, shape index: {}]   ;;  %s244_s4 = inlined_call_operand.vmem [shape: f32[1,4], index: 4, kind: input, shape index: {}]   ;;  %s245_s5 = inlined_call_operand.vmem [shape: f32[8,4], index: 5, kind: output, shape index: {}]  }
   0x1   :  { %168 = vmatprep.subr.bf16.mxu0 %v187_v0  ;;  %v184_v1 = vld [vmem:[%s240_s1] sm:$0xff]   ;;  %170 = vmatprep.mubr.msk.bf16.mxu0 %vm188_vm0, %v187_v0  ;;  %v185_v3 = vld [vmem:[%s242_s3 + $0x8] sm:$0xff]   ;;  %vm150_vm3 = vcmask 31744  }
   0x2   :  { %174 = vmatprep.subr.bf16.mxu1 %v187_v0  ;;  %178 = vmatprep.mubr.msk.bf16.mxu1 %vm188_vm0, %v187_v0  ;;  %v21_v2 = vld [vmem:[%s241_s0] sm:$0xf] }
   0x3   :  { %169 = vmatpush3.bf16.msra.mxu0 %v184_v1  ;;  %175 = vmatpush3.bf16.msra.mxu1 %v185_v3  ;;  %v186_v4 = vld [vmem:[%s242_s3] sm:$0xff]  }
   0x4   :  { %176 = vmatprep.subr.bf16.mxu1 %v187_v0  ;;  %v156_v5 = vld [vmem:[%s243_s2] ss:$0 sm:$0xff] }
   0x5   :  { %v159_v13 = vld [vmem:[%s244_s4] ss:$0 sm:$0xff] }
   0x6   :  { %171 = vmatmul.mubr.msk.bf16.vlgmr.msra.gmra.mxu0 %vm37_vm1, %v21_v2 }
   0x7   :  { %177 = vmatpush3.bf16.msra.mxu1 %v186_v4 }
  0xc6   :  { %v75_v6 = vpop.f32.mrf.mxu0 }
  0xc7   :  { %v76_v7 = vadd.f32 %v156_v5, %v75_v6 }
  0xc8   :  { %v172_v8 = vpop.f32.mrf.mxu0 }
  0xc9   :  { %v81_v9 = vmax.f32 %v76_v7, 0.0 }
  0xca   :  { %v78_v10 = vpop.f32.mrf.mxu0 }
  0xcb   :  { %v82_v11 = vpack.c.bf16 %v81_v9, %v81_v9 }
  0xcc   :  { %v173_v12 = vpop.f32.mrf.mxu0 }
  0xcd   :  { %179 = vmatmul.mubr.msk.bf16.vlgmr.msra.gmra.mxu1 %vm106_vm2, %v82_v11 }
 0x18d   :  { %v144_v14 = vpop.f32.mrf.mxu1 }
 0x18e   :  { %v145_v15 = vadd.f32 %v159_v13, %v144_v14 }
 0x18f   :  { %v180_v16 = vpop.f32.mrf.mxu1 }
 0x190   :  { %151 = vst.msk [vmem:[%s245_s5] sm:$0xff] %vm150_vm3, %v145_v15 }
 0x191   :  { %v147_v17 = vpop.f32.mrf.mxu1 }
 0x193   :  { %v181_v18 = vpop.f32.mrf.mxu1 }

</bundles_post_ra>
